<compile_context>
chip_gen: v6e
topology: v6e:2x2x1
jax: 0.10.0
libtpu: 0.0.40
codegen_flags: <defaults>
</compile_context>

<pallas_src>
import jax
import jax.numpy as jnp
from jax.experimental import pallas as pl
from jax.experimental.pallas import tpu as pltpu


def _copy_kernel(x_ref, o_ref):
    # Pure copy: load the full tile, store the full tile.
    o_ref[...] = x_ref[...]


def _chip_tuning():
    """Return (block_bytes, vmem_limit_bytes), gated per TPU generation."""
    block_bytes = 4 * 1024 * 1024   # v5e / v6e: near the measured ~86% roofline plateau
    vmem_limit = 32 * 1024 * 1024   # above v5e's 16 MiB scoped default; 4 bufs * 4 MiB = 16 MiB
    try:
        info = pltpu.get_tpu_info()
        vmem_cap = getattr(info, "vmem_capacity_bytes", None)
        if vmem_cap is not None and vmem_cap <= 64 * 1024 * 1024:
            # v7x-class: 3.2 TB/s HBM makes the ~0.35 us/step overhead ~1 MB of
            # lost bandwidth per step, so use bigger blocks; 2 in + 2 out bufs
            # at 6 MiB = 24 MiB, limit 48 MiB leaves headroom under 64 MiB VMEM.
            block_bytes = 6 * 1024 * 1024
            vmem_limit = 48 * 1024 * 1024
    except Exception:
        pass  # best-effort; defaults are safe on all generations
    return block_bytes, vmem_limit


def _largest_lane_width(total):
    """Largest multiple-of-128 divisor of `total` that is <= 4096 (or None)."""
    for k in range(32, 0, -1):
        c = 128 * k
        if total % c == 0:
            return c
    return None


def _copy_2d(x2, tile_r, vmem_limit):
    """Streaming copy of a (rows, cols) array, tiled only along rows."""
    rows, cols = x2.shape
    itemsize = x2.dtype.itemsize
    return pl.pallas_call(
        _copy_kernel,
        out_shape=jax.ShapeDtypeStruct((rows, cols), x2.dtype),
        grid=(pl.cdiv(rows, tile_r),),              # 1-D grid: lane axis is whole
        in_specs=[pl.BlockSpec((tile_r, cols), lambda i: (i, 0))],
        out_specs=pl.BlockSpec((tile_r, cols), lambda i: (i, 0)),
        cost_estimate=pl.CostEstimate(
            flops=0, transcendentals=0,
            bytes_accessed=2 * rows * cols * itemsize),
        compiler_params=pltpu.CompilerParams(
            dimension_semantics=("parallel",),      # shard rows across TCs on v7x
            vmem_limit_bytes=vmem_limit),
    )(x2)


@jax.jit
def _identity_copy(x):
    """Materialized identity copy via the Pallas kernel (jit: reshapes are bitcasts)."""
    orig_shape = x.shape
    total = x.size
    itemsize = jnp.dtype(x.dtype).itemsize
    block_bytes, vmem_limit = _chip_tuning()

    flat = x.reshape(total)

    cols = _largest_lane_width(total)
    if cols is not None:
        n_bulk, n_tail = total, 0
    else:
        # Ragged total: copy the 128-aligned bulk lane-dense, handle the
        # (<128-element) tail outside the kernel.
        n_bulk = (total // 128) * 128
        n_tail = total - n_bulk
        cols = _largest_lane_width(n_bulk) if n_bulk else None

    if n_bulk == 0:
        # Fewer than 128 elements: perf irrelevant, one tiny full-extent block.
        out = _copy_2d(flat.reshape(1, total), 1, vmem_limit)
        return out.reshape(orig_shape)

    rows = n_bulk // cols
    bulk = flat[:n_bulk].reshape(rows, cols)

    # Row granularity respecting sublane packing for narrow dtypes
    # (f32 -> 8, bf16 -> 16, int8/fp8 -> 32).
    row_mult = max(8, 32 // itemsize)

    # ~block_bytes per block amortizes the ~0.35 us per-grid-step overhead.
    max_rows = max(row_mult,
                   (block_bytes // (cols * itemsize)) // row_mult * row_mult)
    tile_r = rows if rows <= max_rows else max_rows

    # Keep >=4 row blocks for multi-MiB arrays so the "parallel" axis can be
    # split across both v7x TensorCores (never swallow the whole axis).
    if n_bulk * itemsize > 2 * 1024 * 1024 and rows >= 4 * row_mult:
        tile_r = min(tile_r, max(row_mult, (rows // 4) // row_mult * row_mult))

    out_bulk = _copy_2d(bulk, tile_r, vmem_limit)

    if n_tail:
        out_flat = jnp.concatenate([out_bulk.reshape(n_bulk), flat[n_bulk:]])
    else:
        out_flat = out_bulk.reshape(n_bulk)
    return out_flat.reshape(orig_shape)


def identity_pallas(x, *, materialize=False):
    """Identity.forward(x) = x.

    Default: pure pass-through (identity's ideal HBM cost is 0 -- no kernel is
    launched and the returned array aliases the input, exactly like PyTorch's
    `return x`).  Set materialize=True when the caller requires a freshly
    materialized, non-aliased output buffer; that path runs a lane-dense
    Pallas TPU streaming-copy kernel.
    """
    if not materialize or x.size == 0:
        return x
    return _identity_copy(x)


if __name__ == "__main__":
    key = jax.random.PRNGKey(0)
    # Small NCHW input consistent with a CNN feature map: batch=2, C=4, 16x16.
    x = jax.random.normal(key, (2, 4, 16, 16), dtype=jnp.float32)

    # Fast path: pass-through (no kernel, zero HBM cost).
    y_fast = identity_pallas(x)
    jax.block_until_ready(y_fast)
    assert y_fast.shape == x.shape and y_fast.dtype == x.dtype
    assert bool(jnp.all(y_fast == x)), "pass-through identity mismatch"

    # Materializing path: exercises the lane-dense Pallas copy kernel.
    y = identity_pallas(x, materialize=True)
    jax.block_until_ready(y)
    assert y.shape == x.shape, f"shape mismatch: {y.shape} vs {x.shape}"
    assert y.dtype == x.dtype, f"dtype mismatch: {y.dtype} vs {x.dtype}"
    assert bool(jnp.all(y == x)), "materialized identity mismatch"

    # Tiny ragged total (<128 elements): full-extent single-block path.
    x_tiny = jax.random.normal(jax.random.PRNGKey(1), (7, 3, 5), dtype=jnp.float32)
    y_tiny = identity_pallas(x_tiny, materialize=True)
    jax.block_until_ready(y_tiny)
    assert bool(jnp.all(y_tiny == x_tiny)), "tiny ragged identity mismatch"

    # Ragged total (407 elems): 128-aligned bulk through the kernel + tail.
    x_rag = jax.random.normal(jax.random.PRNGKey(2), (11, 37), dtype=jnp.float32)
    y_rag = identity_pallas(x_rag, materialize=True)
    jax.block_until_ready(y_rag)
    assert y_rag.shape == x_rag.shape and bool(jnp.all(y_rag == x_rag)), \
        "bulk+tail identity mismatch"

    # Multi-block row grid (3 MiB, rows split into >=4 'parallel' blocks).
    x_big = jax.random.normal(jax.random.PRNGKey(3), (1024, 768), dtype=jnp.float32)
    y_big = identity_pallas(x_big, materialize=True)
    jax.block_until_ready(y_big)
    assert bool(jnp.all(y_big == x_big)), "multi-block identity mismatch"

    print("KERNEL_OK")
</pallas_src>

<mosaic_0001>
module attributes {stable_mosaic.version = 11 : i64} {
  func.func @_copy_kernel(%arg0: i32, %arg1: memref<1x2048xf32, #tpu.memory_space<vmem>>, %arg2: memref<1x2048xf32, #tpu.memory_space<vmem>>) attributes {dimension_semantics = [#tpu.dimension_semantics<parallel>], iteration_bounds = array<i64: 1>, scalar_prefetch = 0 : i64, scratch_operands = 0 : i64, tpu.core_type = #tpu.core_type<tc>, window_params = [{transform_indices = @transform_0, window_bounds = array<i64: 1, 2048>}, {transform_indices = @transform_1, window_bounds = array<i64: 1, 2048>}]} {
    %c0 = arith.constant 0 : index
    %c0_0 = arith.constant 0 : index
    %0 = vector.load %arg1[%c0, %c0_0] : memref<1x2048xf32, #tpu.memory_space<vmem>>, vector<1x2048xf32>
    %c0_1 = arith.constant 0 : index
    %c0_2 = arith.constant 0 : index
    %1 = vector.load %arg2[%c0_1, %c0_2] : memref<1x2048xf32, #tpu.memory_space<vmem>>, vector<1x2048xf32>
    tpu.vector_store %arg2[%c0_1, %c0_2], %0 {strides = array<i32>} : memref<1x2048xf32, #tpu.memory_space<vmem>>, vector<1x2048xf32>,
    return
  }
  func.func @transform_0(%arg0: i32) -> (i32, i32) {
    %c0_i32 = arith.constant 0 : i32
    %c0_i32_0 = arith.constant 0 : i32
    return %arg0, %c0_i32 : i32, i32
  }
  func.func @transform_1(%arg0: i32) -> (i32, i32) {
    %c0_i32 = arith.constant 0 : i32
    %c0_i32_0 = arith.constant 0 : i32
    return %arg0, %c0_i32 : i32, i32
  }
}

</mosaic_0001>

<bundles_post_ra>
// kernel: _identity_copy.1
= control target key start
LH: loop header
LB: loop body
LE: loop exit
PB: predicated region body
PF: predicated region fallthrough
CT: control target
= control target key end

     0   :  { %s38_s0 = inlined_call_operand.vmem [shape: f32[1,2048], index: 0, kind: input, shape index: {}]   ;;  %s39_s1 = inlined_call_operand.vmem [shape: f32[1,2048], index: 1, kind: output, shape index: {}]  }
   0x1   :  { %v8_v0 = vld [vmem:[%s38_s0] sm:$0xff]  ;;  %v9_v1 = vld [vmem:[%s38_s0 + $0x8] sm:$0xff] }
   0x2   :  { %10 = vst [vmem:[%s39_s1] sm:$0xff] %v8_v0  ;;  %11 = vst [vmem:[%s39_s1 + $0x8] sm:$0xff] %v9_v1 }

</bundles_post_ra>
